<compile_context>
chip_gen: v7x
topology: tpu7x:2x2x1
jax: 0.10.0
libtpu: 0.0.40
codegen_flags: <defaults>
</compile_context>

<pallas_src>
import functools
import math

import jax
import jax.numpy as jnp
from jax.experimental import pallas as pl
from jax.experimental.pallas import tpu as pltpu


def _actor_kernel(
    # activations / recurrent state
    obs_ref, laser_ref, hc_ref,
    # PreFC
    w_pre_ref, b_pre_ref,
    # FC1 (one logical weight, shipped as its obs-rows and laser-feature-rows)
    w1_obs_ref, w1_las_ref, b1_ref,
    # LSTM: fused input->hidden / hidden->hidden weights + fused bias,
    # gate order (i, f, o, g)
    w_ih_ref, w_hh_ref, b_lstm_ref,
    # FC3 (padded to a 128-lane output slab)
    w3_ref, b3_ref,
    # outputs
    act_ref, hc_out_ref,
    *, h2,
):
    f32 = jnp.float32
    wdt = w_ih_ref.dtype          # weight dtype (bfloat16)

    obs = obs_ref[...]
    laser = laser_ref[...]
    hc = hc_ref[...]              # [B, 2*H2] == h | c
    h = hc[:, :h2]
    c = hc[:, h2:]

    # PreFC + ReLU : laser -> las_output features
    pre = jnp.dot(laser.astype(wdt), w_pre_ref[...],
                  preferred_element_type=f32) + b_pre_ref[...]
    pre = jnp.maximum(pre, 0.0)

    # FC1 on concat([obs, pre]) == obs @ W1[:dim_obs] + pre @ W1[dim_obs:], ReLU
    x = (jnp.dot(obs.astype(wdt), w1_obs_ref[...], preferred_element_type=f32)
         + jnp.dot(pre.astype(wdt), w1_las_ref[...], preferred_element_type=f32)
         + b1_ref[...])
    x = jnp.maximum(x, 0.0)

    # Single LSTM step, all 4 gates from 2 fused matmuls ([B, 4*H2] result).
    gates = (jnp.dot(x.astype(wdt), w_ih_ref[...], preferred_element_type=f32)
             + jnp.dot(h.astype(wdt), w_hh_ref[...], preferred_element_type=f32)
             + b_lstm_ref[...])
    ifo = jax.nn.sigmoid(gates[:, :3 * h2])   # one contiguous sigmoid slab
    g_g = jnp.tanh(gates[:, 3 * h2:])
    i_g = ifo[:, :h2]
    f_g = ifo[:, h2:2 * h2]
    o_g = ifo[:, 2 * h2:]

    c_new = f_g * c + i_g * g_g
    h_new = o_g * jnp.tanh(c_new)

    # FC3 (output padded to 128 lanes; padded columns are zero weights/biases)
    out = jnp.dot(h_new.astype(wdt), w3_ref[...],
                  preferred_element_type=f32) + b3_ref[...]
    act_ref[...] = jnp.tanh(out) * 0.5

    # Combined lane-dense state output: [B, 2*H2] = [B, 128] slab.
    hc_out_ref[:, :h2] = h_new
    hc_out_ref[:, h2:] = c_new


@functools.partial(jax.jit, static_argnames=("dim_action",))
def actor_forward(obs, laser, hidden, params, dim_action):
    """Pallas implementation of Actor.forward.

    obs:    [B, dim_observation] float32
    laser:  [B, dim_laser]       float32
    hidden: (h, c) each [1, B, second_hidden]
    returns (action [B, dim_action], (h_new, c_new) each [1, B, second_hidden])
    """
    h0, c0 = hidden
    B = obs.shape[0]
    H2 = h0.shape[-1]

    hc = jnp.concatenate([h0.reshape(B, H2), c0.reshape(B, H2)],
                         axis=1).astype(jnp.float32)

    inputs = (
        obs.astype(jnp.float32), laser.astype(jnp.float32), hc,
        params["w_pre"], params["b_pre"],
        params["w1_obs"], params["w1_las"], params["b1"],
        params["w_ih"], params["w_hh"], params["b_lstm"],
        params["w3"], params["b3"],
    )
    act_cols = params["w3"].shape[1]          # dim_action padded to 128 lanes
    out_shapes = (
        jax.ShapeDtypeStruct((B, act_cols), jnp.float32),
        jax.ShapeDtypeStruct((B, 2 * H2), jnp.float32),
    )

    vmem = pl.BlockSpec(memory_space=pltpu.VMEM)
    # Single grid point: everything (a few hundred KB) fits one VMEM block.
    # For very large batches, add a batch grid with
    # dimension_semantics=("parallel",) to use both v7x TensorCores.
    act_pad, hc_new = pl.pallas_call(
        functools.partial(_actor_kernel, h2=H2),
        out_shape=out_shapes,
        in_specs=[vmem] * len(inputs),
        out_specs=(vmem, vmem),
        input_output_aliases={2: 1},          # update h|c state in place
    )(*inputs)

    action = act_pad[:, :dim_action]
    h_new = hc_new[:, :H2].reshape(1, B, H2)
    c_new = hc_new[:, H2:].reshape(1, B, H2)
    return action, (h_new, c_new)


def init_actor_params(key, dim_observation, dim_action, dim_laser,
                      las_output=10, hidden_layer=128, second_hidden_layer=64,
                      weight_dtype=jnp.bfloat16):
    """Deterministic synthetic parameters.

    Returns (params, raw):
      params: kernel layout (fused/reordered LSTM gates, bf16 weights,
              128-lane-padded FC3, linear weights pre-transposed to [in, out]).
      raw:    PyTorch-semantics layout used only by the pure-JAX reference.
    """
    ks = jax.random.split(key, 10)
    f32 = jnp.float32
    H, H2 = hidden_layer, second_hidden_layer

    def u(k, shape, scale):
        return jax.random.uniform(k, shape, f32, -scale, scale)

    w_pre = u(ks[0], (dim_laser, las_output), 1.0 / math.sqrt(dim_laser))
    b_pre = u(ks[1], (1, las_output), 1.0 / math.sqrt(dim_laser))

    fc1_in = dim_observation + las_output
    w1 = u(ks[2], (fc1_in, H), 1.0 / math.sqrt(fc1_in))
    b1 = u(ks[3], (1, H), 1.0 / math.sqrt(fc1_in))

    s = 1.0 / math.sqrt(H2)
    w_ih = u(ks[4], (4 * H2, H), s)       # PyTorch layout, gate order i,f,g,o
    w_hh = u(ks[5], (4 * H2, H2), s)
    b_ih = u(ks[6], (1, 4 * H2), s)
    b_hh = u(ks[7], (1, 4 * H2), s)

    w3 = u(ks[8], (H2, dim_action), s)
    b3 = u(ks[9], (1, dim_action), s)

    raw = dict(w_pre=w_pre, b_pre=b_pre, w1=w1, b1=b1,
               w_ih=w_ih, w_hh=w_hh, b_ih=b_ih, b_hh=b_hh, w3=w3, b3=b3)

    # ---- kernel-layout packing -------------------------------------------
    def fuse_gates(mat):                  # mat: [4*H2, in] in order i,f,g,o
        gi, gf, gg, go = (mat[k * H2:(k + 1) * H2] for k in range(4))
        return jnp.concatenate([gi, gf, go, gg], axis=0).T    # [in, 4*H2]

    b_sum = b_ih + b_hh                                        # [1, 4*H2]
    bi, bf_, bg, bo = (b_sum[:, k * H2:(k + 1) * H2] for k in range(4))
    b_lstm = jnp.concatenate([bi, bf_, bo, bg], axis=1)        # order i,f,o,g

    act_cols = ((dim_action + 127) // 128) * 128               # pad to 128 lanes
    w3_pad = jnp.pad(w3, ((0, 0), (0, act_cols - dim_action)))
    b3_pad = jnp.pad(b3, ((0, 0), (0, act_cols - dim_action)))

    wdt = weight_dtype
    params = dict(
        w_pre=w_pre.astype(wdt), b_pre=b_pre,
        w1_obs=w1[:dim_observation].astype(wdt),
        w1_las=w1[dim_observation:].astype(wdt),
        b1=b1,
        w_ih=fuse_gates(w_ih).astype(wdt),
        w_hh=fuse_gates(w_hh).astype(wdt),
        b_lstm=b_lstm,
        w3=w3_pad.astype(wdt), b3=b3_pad,
    )
    return params, raw


def _reference(obs, laser, h0, c0, raw, wdt=jnp.bfloat16):
    """Pure-JAX PyTorch-semantics reference (bf16 matmul inputs, f32 accum)."""
    f32 = jnp.float32

    def mm(x, w):
        return jnp.dot(x.astype(wdt), w.astype(wdt), preferred_element_type=f32)

    pre = jax.nn.relu(mm(laser, raw["w_pre"]) + raw["b_pre"])
    comb = jnp.concatenate([obs, pre], axis=1)
    x = jax.nn.relu(mm(comb, raw["w1"]) + raw["b1"])
    h, c = h0[0], c0[0]
    H2 = h.shape[-1]
    gates = (mm(x, raw["w_ih"].T) + mm(h, raw["w_hh"].T)
             + raw["b_ih"] + raw["b_hh"])
    i = jax.nn.sigmoid(gates[:, 0:H2])
    f = jax.nn.sigmoid(gates[:, H2:2 * H2])
    g = jnp.tanh(gates[:, 2 * H2:3 * H2])
    o = jax.nn.sigmoid(gates[:, 3 * H2:])
    cn = f * c + i * g
    hn = o * jnp.tanh(cn)
    act = jnp.tanh(mm(hn, raw["w3"]) + raw["b3"]) * 0.5
    return act, hn, cn


if __name__ == "__main__":
    # Small shapes consistent with the module: 3-action MADDPG agent.
    B = 4
    dim_observation = 14
    dim_action = 3
    dim_laser = 16
    las_output = 10
    hidden_layer = 128
    second_hidden_layer = 64

    key = jax.random.PRNGKey(0)
    k_obs, k_las, k_h, k_c, k_par = jax.random.split(key, 5)

    obs = jax.random.normal(k_obs, (B, dim_observation), jnp.float32)
    laser = jax.random.normal(k_las, (B, dim_laser), jnp.float32)
    h0 = jax.random.normal(k_h, (1, B, second_hidden_layer), jnp.float32)
    c0 = jax.random.normal(k_c, (1, B, second_hidden_layer), jnp.float32)

    params, raw = init_actor_params(k_par, dim_observation, dim_action,
                                    dim_laser, las_output, hidden_layer,
                                    second_hidden_layer)

    action, (h_new, c_new) = actor_forward(obs, laser, (h0, c0), params,
                                           dim_action=dim_action)
    jax.block_until_ready((action, h_new, c_new))

    assert action.shape == (B, dim_action)
    assert h_new.shape == (1, B, second_hidden_layer)
    assert c_new.shape == (1, B, second_hidden_layer)

    a_ref, h_ref, c_ref = _reference(obs, laser, h0, c0, raw)
    assert jnp.allclose(action, a_ref, atol=2e-3, rtol=2e-3)
    assert jnp.allclose(h_new[0], h_ref, atol=2e-3, rtol=2e-3)
    assert jnp.allclose(c_new[0], c_ref, atol=2e-3, rtol=2e-3)

    print("KERNEL_OK")
</pallas_src>

<mosaic_0001>
module attributes {stable_mosaic.version = 11 : i64} {
  func.func @_actor_kernel(%arg0: memref<4x14xf32, #tpu.memory_space<vmem>>, %arg1: memref<4x16xf32, #tpu.memory_space<vmem>>, %arg2: memref<4x128xf32, #tpu.memory_space<vmem>>, %arg3: memref<16x10xbf16, #tpu.memory_space<vmem>>, %arg4: memref<1x10xf32, #tpu.memory_space<vmem>>, %arg5: memref<14x128xbf16, #tpu.memory_space<vmem>>, %arg6: memref<10x128xbf16, #tpu.memory_space<vmem>>, %arg7: memref<1x128xf32, #tpu.memory_space<vmem>>, %arg8: memref<128x256xbf16, #tpu.memory_space<vmem>>, %arg9: memref<64x256xbf16, #tpu.memory_space<vmem>>, %arg10: memref<1x256xf32, #tpu.memory_space<vmem>>, %arg11: memref<64x128xbf16, #tpu.memory_space<vmem>>, %arg12: memref<1x128xf32, #tpu.memory_space<vmem>>, %arg13: memref<4x128xf32, #tpu.memory_space<vmem>>, %arg14: memref<4x128xf32, #tpu.memory_space<vmem>>) attributes {dimension_semantics = [], scalar_prefetch = 0 : i64, scratch_operands = 0 : i64, tpu.core_type = #tpu.core_type<tc>} {
    %c0 = arith.constant 0 : index
    %c0_0 = arith.constant 0 : index
    %0 = vector.load %arg0[%c0, %c0_0] : memref<4x14xf32, #tpu.memory_space<vmem>>, vector<4x14xf32>
    %c0_1 = arith.constant 0 : index
    %c0_2 = arith.constant 0 : index
    %1 = vector.load %arg1[%c0_1, %c0_2] : memref<4x16xf32, #tpu.memory_space<vmem>>, vector<4x16xf32>
    %c0_3 = arith.constant 0 : index
    %c0_4 = arith.constant 0 : index
    %2 = vector.load %arg2[%c0_3, %c0_4] : memref<4x128xf32, #tpu.memory_space<vmem>>, vector<4x128xf32>
    %3 = vector.extract_strided_slice %2 {offsets = [0, 0], sizes = [4, 64], strides = [1, 1]} : vector<4x128xf32> to vector<4x64xf32>
    %4 = vector.extract_strided_slice %2 {offsets = [0, 64], sizes = [4, 64], strides = [1, 1]} : vector<4x128xf32> to vector<4x64xf32>
    %5 = arith.truncf %1 : vector<4x16xf32> to vector<4x16xbf16>
    %c0_5 = arith.constant 0 : index
    %c0_6 = arith.constant 0 : index
    %6 = vector.load %arg3[%c0_5, %c0_6] : memref<16x10xbf16, #tpu.memory_space<vmem>>, vector<16x10xbf16>
    %cst = arith.constant dense<0.000000e+00> : vector<4x10xf32>
    %7 = tpu.matmul %5, %6, %cst {dimension_numbers = #tpu.dot_dimension_numbers<[1], [0], [0], [1], [0, 0, 1, 1], [], []>} : vector<4x16xbf16>, vector<16x10xbf16>, vector<4x10xf32> -> vector<4x10xf32>
    %c0_7 = arith.constant 0 : index
    %c0_8 = arith.constant 0 : index
    %8 = vector.load %arg4[%c0_7, %c0_8] : memref<1x10xf32, #tpu.memory_space<vmem>>, vector<1x10xf32>
    %9 = vector.broadcast %8 : vector<1x10xf32> to vector<4x10xf32>
    %10 = arith.addf %7, %9 : vector<4x10xf32>
    %cst_9 = arith.constant 0.000000e+00 : f32
    %11 = vector.broadcast %cst_9 : f32 to vector<4x10xf32>
    %12 = arith.maximumf %10, %11 : vector<4x10xf32>
    %13 = arith.truncf %0 : vector<4x14xf32> to vector<4x14xbf16>
    %c0_10 = arith.constant 0 : index
    %c0_11 = arith.constant 0 : index
    %14 = vector.load %arg5[%c0_10, %c0_11] : memref<14x128xbf16, #tpu.memory_space<vmem>>, vector<14x128xbf16>
    %cst_12 = arith.constant dense<0.000000e+00> : vector<4x128xf32>
    %15 = tpu.matmul %13, %14, %cst_12 {dimension_numbers = #tpu.dot_dimension_numbers<[1], [0], [0], [1], [0, 0, 1, 1], [], []>} : vector<4x14xbf16>, vector<14x128xbf16>, vector<4x128xf32> -> vector<4x128xf32>
    %16 = arith.truncf %12 : vector<4x10xf32> to vector<4x10xbf16>
    %c0_13 = arith.constant 0 : index
    %c0_14 = arith.constant 0 : index
    %17 = vector.load %arg6[%c0_13, %c0_14] : memref<10x128xbf16, #tpu.memory_space<vmem>>, vector<10x128xbf16>
    %cst_15 = arith.constant dense<0.000000e+00> : vector<4x128xf32>
    %18 = tpu.matmul %16, %17, %cst_15 {dimension_numbers = #tpu.dot_dimension_numbers<[1], [0], [0], [1], [0, 0, 1, 1], [], []>} : vector<4x10xbf16>, vector<10x128xbf16>, vector<4x128xf32> -> vector<4x128xf32>
    %19 = arith.addf %15, %18 : vector<4x128xf32>
    %c0_16 = arith.constant 0 : index
    %c0_17 = arith.constant 0 : index
    %20 = vector.load %arg7[%c0_16, %c0_17] : memref<1x128xf32, #tpu.memory_space<vmem>>, vector<1x128xf32>
    %21 = vector.broadcast %20 : vector<1x128xf32> to vector<4x128xf32>
    %22 = arith.addf %19, %21 : vector<4x128xf32>
    %cst_18 = arith.constant 0.000000e+00 : f32
    %23 = vector.broadcast %cst_18 : f32 to vector<4x128xf32>
    %24 = arith.maximumf %22, %23 : vector<4x128xf32>
    %25 = arith.truncf %24 : vector<4x128xf32> to vector<4x128xbf16>
    %c0_19 = arith.constant 0 : index
    %c0_20 = arith.constant 0 : index
    %26 = vector.load %arg8[%c0_19, %c0_20] : memref<128x256xbf16, #tpu.memory_space<vmem>>, vector<128x256xbf16>
    %cst_21 = arith.constant dense<0.000000e+00> : vector<4x256xf32>
    %27 = tpu.matmul %25, %26, %cst_21 {dimension_numbers = #tpu.dot_dimension_numbers<[1], [0], [0], [1], [0, 0, 1, 1], [], []>} : vector<4x128xbf16>, vector<128x256xbf16>, vector<4x256xf32> -> vector<4x256xf32>
    %28 = arith.truncf %3 : vector<4x64xf32> to vector<4x64xbf16>
    %c0_22 = arith.constant 0 : index
    %c0_23 = arith.constant 0 : index
    %29 = vector.load %arg9[%c0_22, %c0_23] : memref<64x256xbf16, #tpu.memory_space<vmem>>, vector<64x256xbf16>
    %cst_24 = arith.constant dense<0.000000e+00> : vector<4x256xf32>
    %30 = tpu.matmul %28, %29, %cst_24 {dimension_numbers = #tpu.dot_dimension_numbers<[1], [0], [0], [1], [0, 0, 1, 1], [], []>} : vector<4x64xbf16>, vector<64x256xbf16>, vector<4x256xf32> -> vector<4x256xf32>
    %31 = arith.addf %27, %30 : vector<4x256xf32>
    %c0_25 = arith.constant 0 : index
    %c0_26 = arith.constant 0 : index
    %32 = vector.load %arg10[%c0_25, %c0_26] : memref<1x256xf32, #tpu.memory_space<vmem>>, vector<1x256xf32>
    %33 = vector.broadcast %32 : vector<1x256xf32> to vector<4x256xf32>
    %34 = arith.addf %31, %33 : vector<4x256xf32>
    %35 = vector.extract_strided_slice %34 {offsets = [0, 0], sizes = [4, 192], strides = [1, 1]} : vector<4x256xf32> to vector<4x192xf32>
    %36 = arith.negf %35 : vector<4x192xf32>
    %37 = math.exp %36 : vector<4x192xf32>
    %cst_27 = arith.constant 1.000000e+00 : f32
    %38 = vector.broadcast %cst_27 : f32 to vector<4x192xf32>
    %39 = arith.addf %38, %37 : vector<4x192xf32>
    %40 = arith.divf %38, %39 : vector<4x192xf32>
    %41 = vector.extract_strided_slice %34 {offsets = [0, 192], sizes = [4, 64], strides = [1, 1]} : vector<4x256xf32> to vector<4x64xf32>
    %42 = math.tanh %41 : vector<4x64xf32>
    %43 = vector.extract_strided_slice %40 {offsets = [0, 0], sizes = [4, 64], strides = [1, 1]} : vector<4x192xf32> to vector<4x64xf32>
    %44 = vector.extract_strided_slice %40 {offsets = [0, 64], sizes = [4, 64], strides = [1, 1]} : vector<4x192xf32> to vector<4x64xf32>
    %45 = vector.extract_strided_slice %40 {offsets = [0, 128], sizes = [4, 64], strides = [1, 1]} : vector<4x192xf32> to vector<4x64xf32>
    %46 = arith.mulf %44, %4 : vector<4x64xf32>
    %47 = arith.mulf %43, %42 : vector<4x64xf32>
    %48 = arith.addf %46, %47 : vector<4x64xf32>
    %49 = math.tanh %48 : vector<4x64xf32>
    %50 = arith.mulf %45, %49 : vector<4x64xf32>
    %51 = arith.truncf %50 : vector<4x64xf32> to vector<4x64xbf16>
    %c0_28 = arith.constant 0 : index
    %c0_29 = arith.constant 0 : index
    %52 = vector.load %arg11[%c0_28, %c0_29] : memref<64x128xbf16, #tpu.memory_space<vmem>>, vector<64x128xbf16>
    %cst_30 = arith.constant dense<0.000000e+00> : vector<4x128xf32>
    %53 = tpu.matmul %51, %52, %cst_30 {dimension_numbers = #tpu.dot_dimension_numbers<[1], [0], [0], [1], [0, 0, 1, 1], [], []>} : vector<4x64xbf16>, vector<64x128xbf16>, vector<4x128xf32> -> vector<4x128xf32>
    %c0_31 = arith.constant 0 : index
    %c0_32 = arith.constant 0 : index
    %54 = vector.load %arg12[%c0_31, %c0_32] : memref<1x128xf32, #tpu.memory_space<vmem>>, vector<1x128xf32>
    %55 = vector.broadcast %54 : vector<1x128xf32> to vector<4x128xf32>
    %56 = arith.addf %53, %55 : vector<4x128xf32>
    %57 = math.tanh %56 : vector<4x128xf32>
    %cst_33 = arith.constant 5.000000e-01 : f32
    %58 = vector.broadcast %cst_33 : f32 to vector<4x128xf32>
    %59 = arith.mulf %57, %58 : vector<4x128xf32>
    %c0_34 = arith.constant 0 : index
    %c0_35 = arith.constant 0 : index
    %60 = vector.load %arg13[%c0_34, %c0_35] : memref<4x128xf32, #tpu.memory_space<vmem>>, vector<4x128xf32>
    tpu.vector_store %arg13[%c0_34, %c0_35], %59 {strides = array<i32>} : memref<4x128xf32, #tpu.memory_space<vmem>>, vector<4x128xf32>,
    %c0_36 = arith.constant 0 : index
    %c0_37 = arith.constant 0 : index
    %61 = vector.load %arg14[%c0_36, %c0_37] : memref<4x128xf32, #tpu.memory_space<vmem>>, vector<4x64xf32>
    tpu.vector_store %arg14[%c0_36, %c0_37], %50 {strides = array<i32>} : memref<4x128xf32, #tpu.memory_space<vmem>>, vector<4x64xf32>,
    %c0_38 = arith.constant 0 : index
    %c64 = arith.constant 64 : index
    %62 = vector.load %arg14[%c0_38, %c64] : memref<4x128xf32, #tpu.memory_space<vmem>>, vector<4x64xf32>
    tpu.vector_store %arg14[%c0_38, %c64], %48 {strides = array<i32>} : memref<4x128xf32, #tpu.memory_space<vmem>>, vector<4x64xf32>,
    return
  }
}

</mosaic_0001>

<bundles_post_ra>
// kernel: actor_forward.1
= control target key start
LH: loop header
LB: loop body
LE: loop exit
PB: predicated region body
PF: predicated region fallthrough
CT: control target
= control target key end

     0   :  { %20 = vsyncpa [#allocation3], 0  ;;  %s1305_s0 = inlined_call_operand.hbm [shape: f32[4,14], index: 0, kind: input, shape index: {}]   ;;  %s1306_s1 = inlined_call_operand.hbm [shape: f32[4,16], index: 1, kind: input, shape index: {}]   ;;  %s1307_s2 = inlined_call_operand.vmem [shape: f32[4,128], index: 2, kind: input, shape index: {}, may-alias: {2,14}]   ;;  %s1308_s3 = inlined_call_operand.vmem [shape: bf16[16,10], index: 3, kind: input, shape index: {}]   ;;  %s1309_s4 = inlined_call_operand.vmem [shape: f32[1,10], index: 4, kind: input, shape index: {}]   ;;  %s1310_s5 = inlined_call_operand.vmem [shape: bf16[14,128], index: 5, kind: input, shape index: {}]   ;;  %s1311_s6 = inlined_call_operand.vmem [shape: bf16[10,128], index: 6, kind: input, shape index: {}]   ;;  %s1312_s7 = inlined_call_operand.hbm [shape: f32[1,128], index: 7, kind: input, shape index: {}]   ;;  %s1313_s8 = inlined_call_operand.hbm [shape: bf16[128,256], index: 8, kind: input, shape index: {}]   ;;  %s1314_s9 = inlined_call_operand.hbm [shape: bf16[64,256], index: 9, kind: input, shape index: {}]   ;;  %s1315_s10 = inlined_call_operand.hbm [shape: f32[1,256], index: 10, kind: input, shape index: {}]   ;;  %s1316_s11 = inlined_call_operand.vmem [shape: bf16[64,128], index: 11, kind: input, shape index: {}]   ;;  %s1317_s12 = inlined_call_operand.hbm [shape: f32[1,128], index: 12, kind: input, shape index: {}]   ;;  %s1318_s13 = inlined_call_operand.hbm [shape: f32[4,128], index: 13, kind: output, shape index: {0}]   ;;  %s1319_s14 = inlined_call_operand.vmem [shape: f32[4,128], index: 14, kind: output, shape index: {1}, may-alias: {2,14}]  }
   0x1   :  { %21 = vsyncpa [#allocation6], 0 }
   0x2   :  { %22 = vsyncpa [#allocation9], 0 }
   0x3   :  { %23 = vsyncpa [#allocation12], 0 }
   0x4   :  { %24 = vsyncpa [#allocation4], 0  ;;  %s1045_s29 = smov [#allocation5]   ;;  %s1046_s15 = smov [#allocation8]  }
   0x5   :  { %s41_s30 = sshll.u32 %s1045_s29, 4  ;;  %s70_s16 = sshll.u32 %s1046_s15, 4  ;;  %s42_s30 = int_to_ptr.vmem [resolvable:$true] %s41_s30  ;;  %s1134_s16 = int_to_ptr.vmem [resolvable:$true] %s70_s16 }
   0x6   :  { %s859_s19 = scalar_lea.hbm %s1306_s1, 64 }
   0x7   :  { %p860_p0 = scmp.ne.s32.totalorder %s1306_s1, %s859_s19  ;;  %p863_p1 = scmp.lt.u32.totalorder %s859_s19, %s1306_s1 }
   0x9   :  { %p865_p2 = pnand %p863_p1, %p860_p0 }
   0xb   :  { %868 = shalt.err (!%p865_p2)
}
   0xc   :  { %s869_s24 = scalar_lea.vmem %s42_s30, 64  ;;  %p874_p4 = scmp.lt.s32.totalorder %s42_s30, %s42_s30 }
   0xd   :  { %p870_p3 = scmp.ne.s32.totalorder %s42_s30, %s869_s24  ;;  %p875_p5 = scmp.lt.s32.totalorder %s869_s24, %s869_s24 }
   0xf   :  { %p876_p6 = por %p875_p5, %p874_p4 }
  0x11   :  { %p877_p7 = pnand %p876_p6, %p870_p3 }
  0x13   :  { %880 = shalt.err (!%p877_p7)
}
  0x14   :  { %44 = dma.hbm_to_vmem [thread:$0]  %s1306_s1, 64, %s42_s30, [#allocation6]  }
  0x15   :  { %s881_s29 = scalar_lea.hbm %s1313_s8, 2048 }
  0x16   :  { %p882_p8 = scmp.ne.s32.totalorder %s1313_s8, %s881_s29  ;;  %p885_p9 = scmp.lt.u32.totalorder %s881_s29, %s1313_s8 }
  0x18   :  { %p887_p10 = pnand %p885_p9, %p882_p8 }
  0x1a   :  { %890 = shalt.err (!%p887_p10)
}
  0x1b   :  { %s891_s20 = scalar_lea.vmem %s1134_s16, 2048  ;;  %p896_p12 = scmp.lt.s32.totalorder %s1134_s16, %s1134_s16 }
  0x1c   :  { %p892_p11 = scmp.ne.s32.totalorder %s1134_s16, %s891_s20  ;;  %p897_p13 = scmp.lt.s32.totalorder %s891_s20, %s891_s20 }
  0x1e   :  { %p898_p0 = por %p897_p13, %p896_p12 }
  0x20   :  { %p899_p1 = pnand %p898_p0, %p892_p11 }
  0x22   :  { %902 = shalt.err (!%p899_p1)
}
  0x23   :  { %s1047_s1 = smov 128   ;;  %s1048_s30 = smov 8  }
  0x24   :  { %76 = dma.hbm_to_vmem [thread:$0]  %s1313_s8, 2048, %s1134_s16, [#allocation9], %s1047_s1, %s1047_s1, %s1048_s30  }
  0x25   :  { %s1049_s23 = smov [#allocation11]   ;;  %s1050_s25 = smov [#allocation2]  }
  0x26   :  { %s95_s24 = sshll.u32 %s1049_s23, 4  ;;  %s31_s26 = sshll.u32 %s1050_s25, 4  ;;  %s96_s24 = int_to_ptr.vmem [resolvable:$true] %s95_s24  ;;  %s32_s26 = int_to_ptr.vmem [resolvable:$true] %s31_s26 }
  0x27   :  { %s903_s29 = scalar_lea.hbm %s1315_s10, 32 }
  0x28   :  { %p904_p2 = scmp.ne.s32.totalorder %s1315_s10, %s903_s29  ;;  %p907_p3 = scmp.lt.u32.totalorder %s903_s29, %s1315_s10 }
  0x2a   :  { %p909_p4 = pnand %p907_p3, %p904_p2 }
  0x2c   :  { %912 = shalt.err (!%p909_p4)
}
  0x2d   :  { %s913_s8 = scalar_lea.vmem %s96_s24, 32  ;;  %p918_p6 = scmp.lt.s32.totalorder %s96_s24, %s96_s24 }
  0x2e   :  { %p914_p5 = scmp.ne.s32.totalorder %s96_s24, %s913_s8  ;;  %p919_p7 = scmp.lt.s32.totalorder %s913_s8, %s913_s8 }
  0x30   :  { %p920_p8 = por %p919_p7, %p918_p6 }
  0x32   :  { %p921_p9 = pnand %p920_p8, %p914_p5 }
  0x34   :  { %924 = shalt.err (!%p921_p9)
}
  0x35   :  { %98 = dma.hbm_to_vmem [thread:$0]  %s1315_s10, 32, %s96_s24, [#allocation12]  }
  0x36   :  { %s925_s23 = scalar_lea.hbm %s1305_s0, 64 }
  0x37   :  { %p926_p10 = scmp.ne.s32.totalorder %s1305_s0, %s925_s23  ;;  %p929_p11 = scmp.lt.u32.totalorder %s925_s23, %s1305_s0 }
  0x39   :  { %p931_p12 = pnand %p929_p11, %p926_p10 }
  0x3b   :  { %934 = shalt.err (!%p931_p12)
}
  0x3c   :  { %s935_s15 = scalar_lea.vmem %s32_s26, 64  ;;  %p940_p0 = scmp.lt.s32.totalorder %s32_s26, %s32_s26 }
  0x3d   :  { %p936_p13 = scmp.ne.s32.totalorder %s32_s26, %s935_s15  ;;  %p941_p1 = scmp.lt.s32.totalorder %s935_s15, %s935_s15 }
  0x3f   :  { %p942_p2 = por %p941_p1, %p940_p0 }
  0x41   :  { %p943_p3 = pnand %p942_p2, %p936_p13 }
  0x43   :  { %946 = shalt.err (!%p943_p3)
}
  0x44   :  { %34 = dma.hbm_to_vmem [thread:$0]  %s1305_s0, 64, %s32_s26, [#allocation3]  }
  0x45   :  { %s1051_s17 = smov [#allocation7]   ;;  %s1052_s19 = smov [#allocation10]  }
  0x46   :  { %s61_s18 = sshll.u32 %s1051_s17, 4  ;;  %s82_s8 = sshll.u32 %s1052_s19, 4  ;;  %s62_s18 = int_to_ptr.vmem [resolvable:$true] %s61_s18  ;;  %s1192_s8 = int_to_ptr.vmem [resolvable:$true] %s82_s8 }
  0x47   :  { %s947_s21 = scalar_lea.hbm %s1312_s7, 16 }
  0x48   :  { %p948_p4 = scmp.ne.s32.totalorder %s1312_s7, %s947_s21  ;;  %p951_p5 = scmp.lt.u32.totalorder %s947_s21, %s1312_s7 }
  0x4a   :  { %p953_p6 = pnand %p951_p5, %p948_p4 }
  0x4c   :  { %956 = shalt.err (!%p953_p6)
}
  0x4d   :  { %s957_s0 = scalar_lea.vmem %s62_s18, 16  ;;  %s961_s26 = scalar_lea.vmem %s62_s18, 32 }
  0x4e   :  { %p958_p7 = scmp.ne.s32.totalorder %s62_s18, %s957_s0  ;;  %p962_p8 = scmp.lt.s32.totalorder %s62_s18, %s62_s18 }
  0x4f   :  { %p963_p9 = scmp.lt.s32.totalorder %s961_s26, %s957_s0 }
  0x51   :  { %p964_p10 = por %p963_p9, %p962_p8 }
  0x53   :  { %p965_p11 = pnand %p964_p10, %p958_p7 }
  0x55   :  { %968 = shalt.err (!%p965_p11)
}
  0x56   :  { %64 = dma.hbm_to_vmem [thread:$0]  %s1312_s7, 16, %s62_s18, [#allocation6]  }
  0x57   :  { %s969_s24 = scalar_lea.hbm %s1314_s9, 1024 }
  0x58   :  { %p970_p12 = scmp.ne.s32.totalorder %s1314_s9, %s969_s24  ;;  %p973_p13 = scmp.lt.u32.totalorder %s969_s24, %s1314_s9 }
  0x5a   :  { %p975_p0 = pnand %p973_p13, %p970_p12 }
  0x5c   :  { %978 = shalt.err (!%p975_p0)
}
  0x5d   :  { %s979_s21 = scalar_lea.vmem %s1192_s8, 1024  ;;  %p984_p2 = scmp.lt.s32.totalorder %s1192_s8, %s1192_s8 }
  0x5e   :  { %p980_p1 = scmp.ne.s32.totalorder %s1192_s8, %s979_s21  ;;  %p985_p3 = scmp.lt.s32.totalorder %s979_s21, %s979_s21 }
  0x60   :  { %p986_p4 = por %p985_p3, %p984_p2 }
  0x62   :  { %p987_p5 = pnand %p986_p4, %p980_p1 }
  0x64   :  { %990 = shalt.err (!%p987_p5)
}
  0x65   :  { %88 = dma.hbm_to_vmem [thread:$0]  %s1314_s9, 1024, %s1192_s8, [#allocation9], %s1047_s1, %s1047_s1, %s1048_s30  }
  0x66   :  { %s1053_s22 = smov [#allocation13]   ;;  %s991_s0 = scalar_lea.hbm %s1317_s12, 16 }
  0x67   :  { %s107_s23 = sshll.u32 %s1053_s22, 4  ;;  %p992_p6 = scmp.ne.s32.totalorder %s1317_s12, %s991_s0  ;;  %s108_s23 = int_to_ptr.vmem [resolvable:$true] %s107_s23 }
  0x68   :  { %p995_p7 = scmp.lt.u32.totalorder %s991_s0, %s1317_s12 }
  0x6a   :  { %p997_p8 = pnand %p995_p7, %p992_p6 }
  0x6c   :  { %1000 = shalt.err (!%p997_p8)
}
  0x6d   :  { %s1001_s10 = scalar_lea.vmem %s108_s23, 16  ;;  %s1005_s9 = scalar_lea.vmem %s108_s23, 32 }
  0x6e   :  { %p1002_p9 = scmp.ne.s32.totalorder %s108_s23, %s1001_s10  ;;  %p1006_p10 = scmp.lt.s32.totalorder %s108_s23, %s108_s23 }
  0x6f   :  { %p1007_p11 = scmp.lt.s32.totalorder %s1005_s9, %s1001_s10 }
  0x71   :  { %p1008_p12 = por %p1007_p11, %p1006_p10 }
  0x73   :  { %p1009_p13 = pnand %p1008_p12, %p1002_p9 }
  0x75   :  { %1012 = shalt.err (!%p1009_p13)
}
  0x76   :  { %110 = dma.hbm_to_vmem [thread:$0]  %s1317_s12, 16, %s108_s23, [#allocation12]  }
  0x77   :  { %1035 = dma.done.wait [#allocation3], 64  }
  0x78   :  { %1036 = vsyncadd [#allocation3], 4294967232 }
  0x79   :  { %1037 = dma.done.wait [#allocation6], 80  }
  0x7a   :  { %1038 = vsyncadd [#allocation6], 4294967216 }
  0x7b   :  { %1039 = dma.done.wait [#allocation9], 3072  }
  0x7c   :  { %1040 = vsyncadd [#allocation9], 4294964224 }
  0x7d   :  { %1041 = dma.done.wait [#allocation12], 48  }
  0x7e   :  { %1042 = vsyncadd [#allocation12], 4294967248  ;;  %v1054_v0 = vmov 0.0   ;;  %vm1055_vm0 = vmmov 0   ;;  %v802_v1 = vld [vmem:[%s1308_s3] sm:$0xff]   ;;  %vm265_vm1 = vcmask 1046528   ;;  %v552_v58 = vlaneseq }
  0x7f   :  { %758 = vmatprep.subr.bf16.mxu0 %v1054_v0  ;;  %760 = vmatprep.mubr.msk.bf16.mxu0 %vm1055_vm0, %v1054_v0  ;;  %v134_v2 = vld [vmem:[#allocation5] sm:$0xf]  ;;  %vm152_vm2 = vcmask 130048   ;;  %v133_v7 = vld [vmem:[#allocation2] sm:$0xf]  ;;  %vm212_vm3 = vcmask 1044480  }
  0x80   :  { %764 = vmatprep.subr.bf16.mxu1 %v1054_v0  ;;  %766 = vmatprep.mubr.msk.bf16.mxu1 %vm1055_vm0, %v1054_v0  ;;  %v136_v3 = vpack.c.bf16 %v134_v2, %v134_v2  ;;  %v803_v4 = vld [vmem:[%s1310_s5] sm:$0x7f]   ;;  %v197_v8 = vpack.c.bf16 %v133_v7, %v133_v7  ;;  %vm261_vm4 = vcmask 113664   ;;  %v805_v10 = vld [vmem:[#allocation8] ss:$8 sps:$4 sm:$0xff]   ;;  %vm208_vm5 = vcmask 80896  }
  0x81   :  { %759 = vmatpush3.bf16.msra.mxu0 %v802_v1  ;;  %v267_v5 = vsel %vm265_vm1, %v803_v4, 0  ;;  %v804_v6 = vld [vmem:[%s1311_s6] sm:$0x1f]   ;;  %v807_v11 = vld [vmem:[#allocation8 + $0x4] ss:$8 sps:$4 sm:$0xff]   ;;  %v1056_v48 = vmov 0  }
  0x82   :  { %770 = vmatprep.subr.bf16.mxu0 %v1054_v0  ;;  %v214_v9 = vsel %vm212_vm3, %v804_v6, 0  ;;  %v810_v12 = vld [vmem:[#allocation8 + $0x14] ss:$8 sps:$4 sm:$0xff]   ;;  %v808_v13 = vld [vmem:[#allocation8 + $0x10] ss:$8 sps:$4 sm:$0xff]   ;;  %vm384_vm6 = vcmask 523264  }
  0x83   :  { %765 = vmatpush3.bf16.msra.mxu1 %v214_v9  ;;  %v819_v14 = vld [vmem:[#allocation10 + $0x4] ss:$8 sps:$4 sm:$0xff]   ;;  %v811_v16 = vld [vmem:[#allocation8 + $0x20] ss:$8 sps:$4 sm:$0xff]   ;;  %v816_v17 = vld [vmem:[#allocation8 + $0x34] ss:$8 sps:$4 sm:$0xff]  }
  0x84   :  { %761 = vmatmul.mubr.msk.bf16.vlgmr.msra.gmra.mrb[0].mxu0 %vm152_vm2, %v136_v3  ;;  %v813_v15 = vld [vmem:[#allocation8 + $0x24] ss:$8 sps:$4 sm:$0xff]   ;;  %388 = vmatprep.subr.bf16.mxu1 %v819_v14  ;;  %v814_v18 = vld [vmem:[#allocation8 + $0x30] ss:$8 sps:$4 sm:$0xff]   ;;  %v820_v20 = vld [vmem:[#allocation8 + $0x40] ss:$8 sps:$4 sm:$0xff]  }
  0x85   :  { %771 = vmatpush3.bf16.msra.mxu0 %v267_v5  ;;  %772 = vmatprep.mubr.msk.bf16.mxu0 %vm1055_vm0, %v1054_v0  ;;  %v822_v19 = vld [vmem:[#allocation8 + $0x44] ss:$8 sps:$4 sm:$0xff]   ;;  %v826_v21 = vld [vmem:[#allocation8 + $0x50] ss:$8 sps:$4 sm:$0xff]   ;;  %v828_v22 = vld [vmem:[#allocation8 + $0x54] ss:$8 sps:$4 sm:$0xff]  }
  0x86   :  { %509 = vmatprep.subr.bf16.mxu0 %v807_v11  ;;  %v706_v23 = vld [vmem:[%s1309_s4] ss:$0 sm:$0xff]  ;;  %v817_v30 = vld [vmem:[#allocation10] ss:$8 sps:$4 sm:$0xff]   ;;  %v823_v33 = vld [vmem:[#allocation10 + $0x10] ss:$8 sps:$4 sm:$0xff]  }
  0x87   :  { %v825_v32 = vld [vmem:[#allocation10 + $0x14] ss:$8 sps:$4 sm:$0xff]   ;;  %v831_v34 = vld [vmem:[#allocation10 + $0x24] ss:$8 sps:$4 sm:$0xff]   ;;  %v829_v35 = vld [vmem:[#allocation10 + $0x20] ss:$8 sps:$4 sm:$0xff]  }
  0x88   :  { %v834_v39 = vld [vmem:[#allocation8 + $0x64] ss:$8 sps:$4 sm:$0xff]   ;;  %v832_v41 = vld [vmem:[#allocation8 + $0x60] ss:$8 sps:$4 sm:$0xff]   ;;  %v837_v42 = vld [vmem:[#allocation10 + $0x34] ss:$8 sps:$4 sm:$0xff]  }
  0x89   :  { %v835_v43 = vld [vmem:[#allocation10 + $0x30] ss:$8 sps:$4 sm:$0xff]   ;;  %v840_v44 = vld [vmem:[#allocation8 + $0x74] ss:$8 sps:$4 sm:$0xff]   ;;  %v553_v60 = vshrl.u32 %v552_v58, 7  ;;  %vm680_vm7 = vcmask 519168  }
  0x8a   :  { %v1262_v45 = vld [vmem:[%s1307_s2] sm:$0xf]  ;;  %v713_v50 = vld [vmem:[#allocation7] ss:$0 sm:$0xff]  ;;  %v550_v2 = vld [vmem:[#allocation11] sm:$0x3] }
  0x8b   :  { %v838_v46 = vld [vmem:[#allocation8 + $0x70] ss:$8 sps:$4 sm:$0xff]   ;;  %v335_v47 = vpack.c.bf16 %v1262_v45, %v1262_v45  ;;  %v554_v63 = vsub.s32 0, %v553_v60  ;;  %v558_v4 = vsub.s32 1, %v553_v60  ;;  %s1057_s2 = smov 64   ;;  %vm682_vm8 = vcmask 1043968  }
  0x8c   :  { %773 = vmatmul.mubr.msk.bf16.vlgmr.msra.gmra.mrb[4].mxu0 %vm261_vm4, %v197_v8  ;;  %s1058_s29 = smov [#allocation14]  }
  0x8d   :  { %510 = vmatpush1.bf16.msra.mxu0 %v805_v10  ;;  %541 = vmatprep.mubr.bf16.mxu0 %v1056_v48  ;;  %v555_v3 = vrot.slane %v550_v2, %v554_v63  ;;  %v559_v6 = vrot.slane %v550_v2, %v558_v4  ;;  %s690_s15 = sshll.u32 %s1058_s29, 4  ;;  %s691_s15 = int_to_ptr.vmem [resolvable:$true] %s690_s15 }
  0x8e   :  { %511 = vmatprep.subr.bf16.mxu0 %v810_v12  ;;  %s1013_s10 = scalar_lea.vmem %s691_s15, 64  ;;  %p1018_p1 = scmp.lt.s32.totalorder %s691_s15, %s691_s15 }
  0x8f   :  { %p1014_p0 = scmp.ne.s32.totalorder %s691_s15, %s1013_s10  ;;  %p1019_p2 = scmp.lt.s32.totalorder %s1013_s10, %s1013_s10 }
  0x91   :  { %512 = vmatpush1.bf16.msra.mxu0 %v808_v13  ;;  %p1020_p3 = por %p1019_p2, %p1018_p1 }
  0x92   :  { %513 = vmatprep.subr.bf16.mxu0 %v813_v15 }
  0x93   :  { %p1021_p4 = pnand %p1020_p3, %p1014_p0 }
  0x95   :  { %514 = vmatpush1.bf16.msra.mxu0 %v811_v16 }
  0x96   :  { %515 = vmatprep.subr.bf16.mxu0 %v816_v17 }
  0x99   :  { %516 = vmatpush1.bf16.msra.mxu0 %v814_v18 }
  0x9a   :  { %517 = vmatprep.subr.bf16.mxu0 %v822_v19 }
  0x9d   :  { %518 = vmatpush1.bf16.msra.mxu0 %v820_v20 }
  0x9e   :  { %519 = vmatprep.subr.bf16.mxu0 %v828_v22  ;;  %v842_v22 = vld [vmem:[%s1316_s11 + $0x8] sm:$0xff]  }
  0xa1   :  { %520 = vmatpush1.bf16.msra.mxu0 %v826_v21  ;;  %v841_v21 = vld [vmem:[%s1316_s11] sm:$0xff]  }
  0xa2   :  { %521 = vmatprep.subr.bf16.mxu0 %v834_v39 }
  0xa5   :  { %522 = vmatpush1.bf16.msra.mxu0 %v832_v41 }
  0xa6   :  { %523 = vmatprep.subr.bf16.mxu0 %v840_v44 }
  0xa9   :  { %524 = vmatpush1.bf16.msra.mxu0 %v838_v46 }
 0x157   :  { %v190_v24 = vpop.f32.mrb[0].mxu0 }
 0x158   :  { %v191_v25 = vadd.f32 %v706_v23, %v190_v24  ;;  %v762_v26 = vpop.f32.mrb[1].mxu0  ;;  %v843_v23 = vld [vmem:[%s1316_s11 + $0x10] sm:$0xff]  }
 0x159   :  { %v193_v27 = vpop.f32.mrb[2].mxu0  ;;  %v844_v26 = vld [vmem:[%s1316_s11 + $0x18] sm:$0xff]  }
 0x15a   :  { %v196_v28 = vmax.f32 %v191_v25, 0.0  ;;  %v763_v29 = vpop.f32.mrb[3].mxu0 }
 0x15c   :  { %v200_v31 = vpack.c.bf16 %v196_v28, %v196_v28 }
 0x15e   :  { %767 = vmatmul.mubr.msk.bf16.vlgmr.msra.gmra.mrb[0].mxu1 %vm208_vm5, %v200_v31 }
 0x15f   :  { %389 = vmatpush1.bf16.msra.mxu1 %v817_v30  ;;  %v303_v36 = vpop.f32.mrb[4].mxu0  ;;  %420 = vmatprep.mubr.bf16.mxu1 %v1056_v48 }
 0x160   :  { %390 = vmatprep.subr.bf16.mxu1 %v825_v32  ;;  %v774_v37 = vpop.f32.mrb[5].mxu0 }
 0x161   :  { %v306_v38 = vpop.f32.mrb[6].mxu0 }
 0x162   :  { %v775_v40 = vpop.f32.mrb[7].mxu0 }
 0x163   :  { %391 = vmatpush1.bf16.msra.mxu1 %v823_v33 }
 0x164   :  { %392 = vmatprep.subr.bf16.mxu1 %v831_v34 }
 0x167   :  { %393 = vmatpush1.bf16.msra.mxu1 %v829_v35  ;;  %v741_v35 = vld [vmem:[#allocation13] ss:$0 sm:$0xff] }
 0x168   :  { %394 = vmatprep.subr.bf16.mxu1 %v837_v42 }
 0x16b   :  { %395 = vmatpush1.bf16.msra.mxu1 %v835_v43 }
 0x16c   :  { %776 = vmatprep.subr.bf16.mxu1 %v1054_v0 }
 0x16e   :  { %722 = vmatmul.mubr.msk.bf16.vlgmr.msra.gmra.mrb[4].mxu1 %vm384_vm6, %v335_v47 }
 0x16f   :  { %784 = vmatprep.mubr.msk.bf16.mxu1 %vm1055_vm0, %v1054_v0  ;;  %777 = vmatpush3.bf16.msra.mxu1 %v841_v21 }
 0x170   :  { %778 = vmatprep.subr.bf16.mxu1 %v1054_v0 }
 0x173   :  { %779 = vmatpush3.bf16.msra.mxu1 %v842_v22 }
 0x174   :  { %780 = vmatprep.subr.bf16.mxu1 %v1054_v0 }
 0x177   :  { %781 = vmatpush3.bf16.msra.mxu1 %v843_v23 }
 0x178   :  { %782 = vmatprep.subr.bf16.mxu1 %v1054_v0 }
 0x17b   :  { %783 = vmatpush3.bf16.msra.mxu1 %v844_v26 }
 0x231   :  { %v250_v49 = vpop.f32.mrb[0].mxu1 }
 0x232   :  { %v304_v51 = vadd.f32 %v303_v36, %v250_v49  ;;  %v768_v52 = vpop.f32.mrb[1].mxu1 }
 0x233   :  { %v253_v53 = vpop.f32.mrb[2].mxu1 }
 0x234   :  { %v316_v54 = vadd.f32 %v713_v50, %v304_v51  ;;  %v769_v55 = vpop.f32.mrb[3].mxu1 }
 0x236   :  { %v317_v56 = vmax.f32 %v316_v54, 0.0 }
 0x238   :  { %v318_v57 = vpack.c.bf16 %v317_v56, %v317_v56 }
 0x23a   :  { %542 = vmatmul.mubr.bf16.vlgmr.msra.gmra.mrb[8].mxu0 %v318_v57 }
 0x241   :  { %v422_v59 = vpop.f32.mrb[4].mxu1 }
 0x242   :  { %v424_v61 = vpop.f32.mrb[5].mxu1 }
 0x243   :  { %v426_v62 = vpop.f32.mrb[6].mxu1 }
 0x244   :  { %v427_v1 = vpop.f32.mrb[7].mxu1 }
 0x30d   :  { %v543_v5 = vpop.f32.mrb[8].mxu0 }
 0x30e   :  { %v544_v7 = vadd.f32 %v543_v5, %v422_v59  ;;  %v545_v8 = vpop.f32.mrb[9].mxu0 }
 0x30f   :  { %v546_v9 = vadd.f32 %v545_v8, %v424_v61  ;;  %v547_v10 = vpop.f32.mrb[10].mxu0 }
 0x310   :  { %v562_v11 = vadd.f32 %v555_v3, %v544_v7  ;;  %v548_v12 = vpop.f32.mrb[11].mxu0 }
 0x311   :  { %v563_v13 = vadd.f32 %v559_v6, %v546_v9 }
 0x312   :  { %v739_v15 = vmul.f32 -1.442695, %v562_v11 }
 0x313   :  { %845 = vtanh.f32 %v563_v13  ;;  %v740_v29 = vmul.f32 -1.442695, %v563_v13 }
 0x314   :  { %847 = vpow2.f32 %v739_v15 }
 0x31d   :  { %v846_v14 = vpop.eup %845 }
 0x31e   :  { %579 = vrot.lane.b32.xlu0 %v846_v14, %s1057_s2  ;;  %v848_v16 = vpop.eup %847 }
 0x31f   :  { %v570_v17 = vadd.f32 1.0, %v848_v16 }
 0x321   :  { %849 = vrcp.f32 %v570_v17 }
 0x32b   :  { %v850_v18 = vpop.eup %849 }
 0x32c   :  { %v577_v24 = vmul.f32 %v850_v18, %v1262_v45 }
 0x390   :  { %v580_v19 = vpop.permute.xlu0 %579 }
 0x391   :  { %v582_v20 = vmul.f32 %v850_v18, %v580_v19 }
 0x393   :  { %584 = vrot.lane.b32.xlu0 %v582_v20, %s1057_s2 }
 0x405   :  { %v585_v25 = vpop.permute.xlu0 %584 }
 0x406   :  { %v587_v27 = vadd.f32 %v585_v25, %v577_v24 }
 0x408   :  { %851 = vtanh.f32 %v587_v27 }
 0x409   :  { %853 = vpow2.f32 %v740_v29 }
 0x412   :  { %v852_v28 = vpop.eup %851 }
 0x413   :  { %590 = vrot.lane.b32.xlu1 %v852_v28, %s1057_s2  ;;  %v854_v30 = vpop.eup %853 }
 0x414   :  { %v571_v31 = vadd.f32 1.0, %v854_v30 }
 0x416   :  { %855 = vrcp.f32 %v571_v31 }
 0x420   :  { %v856_v32 = vpop.eup %855 }
 0x485   :  { %v591_v0 = vpop.permute.xlu1 %590 }
 0x486   :  { %v593_v33 = vmul.f32 %v856_v32, %v591_v0 }
 0x488   :  { %v594_v34 = vpack.c.bf16 %v593_v33, %v593_v33  ;;  %681 = vst.msk [vmem:[%s1319_s14] sm:$0xf] %vm680_vm7, %v593_v33 }
 0x489   :  { %683 = vst.msk [vmem:[%s1319_s14] sm:$0xf] %vm682_vm8, %v587_v27 }
 0x48a   :  { %785 = vmatmul.mubr.msk.bf16.vlgmr.msra.gmra.mrb[8].mxu1 %vm384_vm6, %v594_v34 }
 0x55d   :  { %v671_v36 = vpop.f32.mrb[8].mxu1 }
 0x55e   :  { %v672_v37 = vadd.f32 %v741_v35, %v671_v36  ;;  %v786_v38 = vpop.f32.mrb[9].mxu1 }
 0x55f   :  { %v674_v39 = vpop.f32.mrb[10].mxu1 }
 0x560   :  { %857 = vtanh.f32 %v672_v37  ;;  %v787_v40 = vpop.f32.mrb[11].mxu1 }
 0x56a   :  { %v858_v41 = vpop.eup %857 }
 0x56b   :  { %v678_v42 = vmul.f32 0.5, %v858_v41 }
 0x56d   :  { %679 = vst [vmem:[#allocation14] sm:$0xf] %v678_v42 }
 0x56e   :  { %1024 = shalt.err (!%p1021_p4)
}
 0x56f   :  { %s1025_s1 = scalar_lea.hbm %s1318_s13, 64 }
 0x570   :  { %p1026_p5 = scmp.ne.s32.totalorder %s1318_s13, %s1025_s1  ;;  %p1029_p6 = scmp.lt.u32.totalorder %s1025_s1, %s1318_s13 }
 0x572   :  { %p1031_p7 = pnand %p1029_p6, %p1026_p5 }
 0x574   :  { %1034 = shalt.err (!%p1031_p7)
}
 0x575   :  { %693 = dma.vmem_to_hbm [thread:$0]  %s691_s15, 64, %s1318_s13, [#allocation4]  }
 0x576   :  { %1043 = dma.done.wait [#allocation4], 64  }
 0x577   :  { %1044 = vsyncadd [#allocation4], 4294967232 }
 0x578   :  { %701 = vsyncpa [#allocation3], 1 }
 0x579   :  { %702 = vsyncpa [#allocation6], 1 }
 0x57a   :  { %703 = vsyncpa [#allocation9], 1 }
 0x57b   :  { %704 = vsyncpa [#allocation12], 1 }
 0x57c   :  { %705 = vsyncpa [#allocation4], 1 }

</bundles_post_ra>
